<compile_context>
chip_gen: v6e
topology: v6e:2x2x1
jax: 0.10.0
libtpu: 0.0.40
codegen_flags: <defaults>
</compile_context>

<pallas_src>
import functools

import jax
import jax.numpy as jnp
from jax.experimental import pallas as pl
from jax.experimental.pallas import tpu as pltpu

GAMMA = 1.5
ALPHA = 0.25

LANES = 128
MAX_TILE_ROWS = 8192        # 4 MiB per f32 input tile; 2 inputs x 2 buffers = 16 MiB
PAD_GRAN = 16 * LANES       # kernel consumes a 16x128-aligned prefix (bf16-safe tiling)


def _num_tensorcores():
    """2 TensorCores per chip on v7x (and megacore v4/v5p), 1 on v5e/v6e.

    A wrong guess is only a perf detail (one extra clamped loop iteration or a
    missing core split), never a correctness issue, so fall back to 2 on any
    lookup failure."""
    try:
        kind = jax.devices()[0].device_kind.lower()
    except Exception:
        return 2
    for tag in ("v5 lite", "v5e", "v5lite", "v6 lite", "v6e", "v6lite"):
        if tag in kind:
            return 1
    return 2


def _focal_elementwise(x, y, gamma, alpha):
    """Element-wise focal-weighted BCE-with-logits, float32 math."""
    x = x.astype(jnp.float32)
    y = y.astype(jnp.float32)
    # BCEWithLogitsLoss(reduction='none'), numerically stable form:
    #   max(x,0) - x*y + log1p(exp(-|x|));  reuse e = exp(-|x|) for sigmoid.
    e = jnp.exp(-jnp.abs(x))
    bce = jnp.maximum(x, 0.0) - x * y + jnp.log1p(e)
    inv = 1.0 / (1.0 + e)
    p = jnp.where(x >= 0, inv, e * inv)                    # == sigmoid(x)
    # Folded focal factors:
    #   1 - p_t      = p + y*(1 - 2p)
    #   alpha_factor = (1-alpha) + y*(2*alpha - 1)
    t = jnp.maximum(p + y * (1.0 - 2.0 * p), 0.0)          # clamp guards sqrt/pow rounding
    alpha_factor = (1.0 - alpha) + y * (2.0 * alpha - 1.0)
    if gamma == 1.5:
        modulating = t * jnp.sqrt(t)                       # 1 EUP sqrt + 1 VPU mul
    elif gamma == 2.0:
        modulating = t * t
    elif gamma == 1.0:
        modulating = t
    elif gamma == 0.0:
        modulating = jnp.ones_like(t)
    else:
        modulating = jnp.power(t, jnp.float32(gamma))
    return bce * alpha_factor * modulating


def _focal_loss_kernel(pred_ref, true_ref, acc_ref, *, gamma, alpha,
                       rows_valid, tile_rows, blocks_per_core):
    c = pl.program_id(0)   # core-split ("parallel") axis
    i = pl.program_id(1)   # streaming ("arbitrary") axis

    @pl.when(i == 0)
    def _():
        acc_ref[...] = jnp.zeros_like(acc_ref)

    loss = _focal_elementwise(pred_ref[...], true_ref[...], gamma, alpha)

    # Unclamped block index: the index_map clamps so edge cores never DMA past
    # the array, but accumulation decisions use the true position.
    block = c * blocks_per_core + i
    row_start = block * tile_rows
    is_full = row_start + tile_rows <= rows_valid

    def _reduce(v):
        # (tile_rows,128) -> (1,8,128) with pure vreg adds (layout-preserving
        # reshape); the single cross-lane reduce happens once in the wrapper.
        return v.reshape(1, tile_rows // 8, 8, LANES).sum(axis=1)

    @pl.when(is_full)
    def _():   # fast path: interior tiles, no per-element mask arithmetic
        acc_ref[...] += _reduce(loss)

    @pl.when(jnp.logical_not(is_full))
    def _():   # ragged edge tile / clamped re-read tile on the last core
        row = jax.lax.broadcasted_iota(jnp.int32, (tile_rows, LANES), 0)
        acc_ref[...] += _reduce(jnp.where(row_start + row < rows_valid, loss, 0.0))


def focal_loss(pred, true, gamma=GAMMA, alpha=ALPHA):
    """Focal loss with 'mean' reduction. pred/true: same-shaped arrays (any rank)."""
    assert pred.shape == true.shape
    n = pred.size
    assert n > 0

    pred_f = pred.reshape(-1)
    true_f = true.reshape(-1)

    # Kernel consumes the 16*128-aligned prefix; the (<2048-element) tail is
    # summed with plain jnp.  No jnp.pad -> no extra full-array HBM copy.
    n_aligned = n - (n % PAD_GRAN)

    num_cores = _num_tensorcores()
    total = jnp.float32(0.0)

    if n_aligned:
        rows = n_aligned // LANES                          # multiple of 16
        pred2 = pred_f[:n_aligned].reshape(rows, LANES)
        true2 = true_f[:n_aligned].reshape(rows, LANES)

        tile_rows = min(MAX_TILE_ROWS, rows)
        num_blocks = pl.cdiv(rows, tile_rows)
        blocks_per_core = pl.cdiv(num_blocks, num_cores)

        kernel = functools.partial(
            _focal_loss_kernel,
            gamma=gamma, alpha=alpha, rows_valid=rows,
            tile_rows=tile_rows, blocks_per_core=blocks_per_core,
        )

        if num_cores * blocks_per_core == num_blocks:
            in_map = lambda c, i: (c * blocks_per_core + i, 0)
        else:
            # Clamp so the last core never DMAs past the array; the in-kernel
            # is_full / mask logic (based on the unclamped index) makes any
            # re-read block contribute exactly zero.
            in_map = lambda c, i: (jnp.minimum(c * blocks_per_core + i,
                                               num_blocks - 1), 0)
        tile_spec = pl.BlockSpec((tile_rows, LANES), in_map)

        # Double-buffered inputs must fit scoped VMEM (v5e's default is 16 MiB);
        # stay well under v7x's 64 MiB physical VMEM.
        tile_bytes = tile_rows * LANES * (pred2.dtype.itemsize
                                          + true2.dtype.itemsize)
        vmem_limit = min(48 * 1024 * 1024, 2 * tile_bytes + (8 << 20))

        partials = pl.pallas_call(
            kernel,
            out_shape=jax.ShapeDtypeStruct((num_cores, 8, LANES), jnp.float32),
            grid_spec=pltpu.PrefetchScalarGridSpec(
                num_scalar_prefetch=0,
                grid=(num_cores, blocks_per_core),
                in_specs=[tile_spec, tile_spec],
                out_specs=pl.BlockSpec((1, 8, LANES), lambda c, i: (c, 0, 0)),
            ),
            compiler_params=pltpu.CompilerParams(
                dimension_semantics=("parallel", "arbitrary"),
                vmem_limit_bytes=vmem_limit,
            ),
        )(pred2, true2)
        total = total + jnp.sum(partials)

    if n_aligned < n:
        total = total + jnp.sum(
            _focal_elementwise(pred_f[n_aligned:], true_f[n_aligned:], gamma, alpha))

    # reduction == 'mean': one cross-lane reduce + divide, outside the hot loop.
    return total / jnp.float32(n)


def _focal_loss_ref(pred, true, gamma=GAMMA, alpha=ALPHA):
    x = pred.astype(jnp.float32)
    y = true.astype(jnp.float32)
    bce = jnp.maximum(x, 0.0) - x * y + jnp.log1p(jnp.exp(-jnp.abs(x)))
    p = jax.nn.sigmoid(x)
    p_t = y * p + (1.0 - y) * (1.0 - p)
    af = y * alpha + (1.0 - y) * (1.0 - alpha)
    mf = (1.0 - p_t) ** gamma
    return jnp.mean(bce * af * mf)


if __name__ == "__main__":
    key = jax.random.PRNGKey(0)
    k1, k2 = jax.random.split(key)
    # Small NCHW-shaped logits / binary targets (as produced upstream of the loss).
    pred = jax.random.normal(k1, (2, 4, 16, 16), dtype=jnp.float32) * 2.0
    true = jax.random.bernoulli(k2, 0.3, (2, 4, 16, 16)).astype(jnp.float32)

    loss = focal_loss(pred, true)
    jax.block_until_ready(loss)

    ref = _focal_loss_ref(pred, true)
    assert jnp.allclose(loss, ref, rtol=1e-5, atol=1e-6), (loss, ref)

    print("KERNEL_OK")
</pallas_src>

<mosaic_0001>
module attributes {stable_mosaic.version = 11 : i64} {
  func.func @_focal_loss_kernel(%arg0: i32, %arg1: i32, %arg2: memref<16x128xf32, #tpu.memory_space<vmem>>, %arg3: memref<16x128xf32, #tpu.memory_space<vmem>>, %arg4: memref<1x8x128xf32, #tpu.memory_space<vmem>>) attributes {dimension_semantics = [#tpu.dimension_semantics<parallel>, #tpu.dimension_semantics<arbitrary>], iteration_bounds = array<i64: 2, 1>, scalar_prefetch = 0 : i64, scratch_operands = 0 : i64, tpu.core_type = #tpu.core_type<tc>, window_params = [{transform_indices = @transform_0, window_bounds = array<i64: 16, 128>}, {transform_indices = @transform_1, window_bounds = array<i64: 16, 128>}, {transform_indices = @transform_2, window_bounds = array<i64: 1, 8, 128>}]} {
    %c0_i32 = arith.constant 0 : i32
    %0 = arith.cmpi eq, %arg1, %c0_i32 : i32
    %1 = arith.extui %0 : i1 to i32
    %c0_i32_0 = arith.constant 0 : i32
    %2 = arith.cmpi ne, %1, %c0_i32_0 : i32
    scf.if %2 {
      %cst_17 = arith.constant 0.000000e+00 : f32
      %49 = vector.broadcast %cst_17 : f32 to vector<1x8x128xf32>
      %c0_18 = arith.constant 0 : index
      %c0_19 = arith.constant 0 : index
      %c0_20 = arith.constant 0 : index
      %50 = vector.load %arg4[%c0_18, %c0_19, %c0_20] : memref<1x8x128xf32, #tpu.memory_space<vmem>>, vector<1x8x128xf32>
      tpu.vector_store %arg4[%c0_18, %c0_19, %c0_20], %49 {strides = array<i32>} : memref<1x8x128xf32, #tpu.memory_space<vmem>>, vector<1x8x128xf32>,
    } else {
    }
    %c0 = arith.constant 0 : index
    %c0_1 = arith.constant 0 : index
    %3 = vector.load %arg2[%c0, %c0_1] : memref<16x128xf32, #tpu.memory_space<vmem>>, vector<16x128xf32>
    %c0_2 = arith.constant 0 : index
    %c0_3 = arith.constant 0 : index
    %4 = vector.load %arg3[%c0_2, %c0_3] : memref<16x128xf32, #tpu.memory_space<vmem>>, vector<16x128xf32>
    %5 = math.absf %3 : vector<16x128xf32>
    %cst = arith.constant 0.000000e+00 : f32
    %6 = vector.broadcast %cst : f32 to vector<16x128xf32>
    %7 = arith.subf %6, %5 : vector<16x128xf32>
    %8 = math.exp %7 : vector<16x128xf32>
    %cst_4 = arith.constant 0.000000e+00 : f32
    %9 = vector.broadcast %cst_4 : f32 to vector<16x128xf32>
    %10 = arith.maximumf %3, %9 : vector<16x128xf32>
    %11 = arith.mulf %3, %4 : vector<16x128xf32>
    %12 = arith.subf %10, %11 : vector<16x128xf32>
    %13 = math.log1p %8 : vector<16x128xf32>
    %14 = arith.addf %12, %13 : vector<16x128xf32>
    %cst_5 = arith.constant 1.000000e+00 : f32
    %15 = vector.broadcast %cst_5 : f32 to vector<16x128xf32>
    %16 = arith.addf %15, %8 : vector<16x128xf32>
    %cst_6 = arith.constant 1.000000e+00 : f32
    %17 = vector.broadcast %cst_6 : f32 to vector<16x128xf32>
    %18 = arith.divf %17, %16 : vector<16x128xf32>
    %cst_7 = arith.constant 0.000000e+00 : f32
    %19 = vector.broadcast %cst_7 : f32 to vector<16x128xf32>
    %20 = arith.cmpf oge, %3, %19 : vector<16x128xf32>
    %21 = arith.mulf %8, %18 : vector<16x128xf32>
    %22 = arith.select %20, %18, %21 : vector<16x128xi1>, vector<16x128xf32>
    %cst_8 = arith.constant 2.000000e+00 : f32
    %23 = vector.broadcast %cst_8 : f32 to vector<16x128xf32>
    %24 = arith.mulf %23, %22 : vector<16x128xf32>
    %cst_9 = arith.constant 1.000000e+00 : f32
    %25 = vector.broadcast %cst_9 : f32 to vector<16x128xf32>
    %26 = arith.subf %25, %24 : vector<16x128xf32>
    %27 = arith.mulf %4, %26 : vector<16x128xf32>
    %28 = arith.addf %22, %27 : vector<16x128xf32>
    %cst_10 = arith.constant 0.000000e+00 : f32
    %29 = vector.broadcast %cst_10 : f32 to vector<16x128xf32>
    %30 = arith.maximumf %28, %29 : vector<16x128xf32>
    %cst_11 = arith.constant -5.000000e-01 : f32
    %31 = vector.broadcast %cst_11 : f32 to vector<16x128xf32>
    %32 = arith.mulf %4, %31 : vector<16x128xf32>
    %cst_12 = arith.constant 7.500000e-01 : f32
    %33 = vector.broadcast %cst_12 : f32 to vector<16x128xf32>
    %34 = arith.addf %33, %32 : vector<16x128xf32>
    %35 = math.sqrt %30 : vector<16x128xf32>
    %36 = arith.mulf %30, %35 : vector<16x128xf32>
    %37 = arith.mulf %14, %34 : vector<16x128xf32>
    %38 = arith.mulf %37, %36 : vector<16x128xf32>
    %c1_i32 = arith.constant 1 : i32
    %39 = arith.muli %arg0, %c1_i32 : i32
    %40 = arith.addi %39, %arg1 : i32
    %c16_i32 = arith.constant 16 : i32
    %41 = arith.muli %40, %c16_i32 : i32
    %c16_i32_13 = arith.constant 16 : i32
    %42 = arith.addi %41, %c16_i32_13 : i32
    %c16_i32_14 = arith.constant 16 : i32
    %43 = arith.cmpi sle, %42, %c16_i32_14 : i32
    %44 = arith.extui %43 : i1 to i32
    %c0_i32_15 = arith.constant 0 : i32
    %45 = arith.cmpi ne, %44, %c0_i32_15 : i32
    scf.if %45 {
      %c0_17 = arith.constant 0 : index
      %c0_18 = arith.constant 0 : index
      %c0_19 = arith.constant 0 : index
      %49 = vector.load %arg4[%c0_17, %c0_18, %c0_19] : memref<1x8x128xf32, #tpu.memory_space<vmem>>, vector<1x8x128xf32>
      %50 = vector.shape_cast %38 : vector<16x128xf32> to vector<1x2x8x128xf32>
      %cst_20 = arith.constant dense<0.000000e+00> : vector<1x8x128xf32>
      %51 = vector.multi_reduction <add>, %50, %cst_20 [1] : vector<1x2x8x128xf32> to vector<1x8x128xf32>
      %52 = arith.addf %49, %51 : vector<1x8x128xf32>
      %c0_21 = arith.constant 0 : index
      %c0_22 = arith.constant 0 : index
      %c0_23 = arith.constant 0 : index
      %53 = vector.load %arg4[%c0_21, %c0_22, %c0_23] : memref<1x8x128xf32, #tpu.memory_space<vmem>>, vector<1x8x128xf32>
      tpu.vector_store %arg4[%c0_21, %c0_22, %c0_23], %52 {strides = array<i32>} : memref<1x8x128xf32, #tpu.memory_space<vmem>>, vector<1x8x128xf32>,
    } else {
    }
    %true = arith.constant true
    %46 = arith.xori %43, %true : i1
    %47 = arith.extui %46 : i1 to i32
    %c0_i32_16 = arith.constant 0 : i32
    %48 = arith.cmpi ne, %47, %c0_i32_16 : i32
    scf.if %48 {
      %49 = tpu.iota {dimensions = array<i32: 0>} : vector<16x128xi32>
      %c0_17 = arith.constant 0 : index
      %c0_18 = arith.constant 0 : index
      %c0_19 = arith.constant 0 : index
      %50 = vector.load %arg4[%c0_17, %c0_18, %c0_19] : memref<1x8x128xf32, #tpu.memory_space<vmem>>, vector<1x8x128xf32>
      %51 = vector.broadcast %41 : i32 to vector<16x128xi32>
      %52 = arith.addi %51, %49 : vector<16x128xi32>
      %c16_i32_20 = arith.constant 16 : i32
      %53 = vector.broadcast %c16_i32_20 : i32 to vector<16x128xi32>
      %54 = arith.cmpi slt, %52, %53 : vector<16x128xi32>
      %cst_21 = arith.constant 0.000000e+00 : f32
      %55 = vector.broadcast %cst_21 : f32 to vector<16x128xf32>
      %56 = arith.select %54, %38, %55 : vector<16x128xi1>, vector<16x128xf32>
      %57 = vector.shape_cast %56 : vector<16x128xf32> to vector<1x2x8x128xf32>
      %cst_22 = arith.constant dense<0.000000e+00> : vector<1x8x128xf32>
      %58 = vector.multi_reduction <add>, %57, %cst_22 [1] : vector<1x2x8x128xf32> to vector<1x8x128xf32>
      %59 = arith.addf %50, %58 : vector<1x8x128xf32>
      %c0_23 = arith.constant 0 : index
      %c0_24 = arith.constant 0 : index
      %c0_25 = arith.constant 0 : index
      %60 = vector.load %arg4[%c0_23, %c0_24, %c0_25] : memref<1x8x128xf32, #tpu.memory_space<vmem>>, vector<1x8x128xf32>
      tpu.vector_store %arg4[%c0_23, %c0_24, %c0_25], %59 {strides = array<i32>} : memref<1x8x128xf32, #tpu.memory_space<vmem>>, vector<1x8x128xf32>,
    } else {
    }
    return
  }
  func.func @transform_0(%arg0: i32, %arg1: i32) -> (i32, i32) {
    %c1_i32 = arith.constant 1 : i32
    %0 = arith.muli %arg0, %c1_i32 : i32
    %1 = arith.addi %0, %arg1 : i32
    %c0_i32 = arith.constant 0 : i32
    %2 = arith.minsi %1, %c0_i32 : i32
    %c0_i32_0 = arith.constant 0 : i32
    %c0_i32_1 = arith.constant 0 : i32
    return %2, %c0_i32_0 : i32, i32
  }
  func.func @transform_1(%arg0: i32, %arg1: i32) -> (i32, i32) {
    %c1_i32 = arith.constant 1 : i32
    %0 = arith.muli %arg0, %c1_i32 : i32
    %1 = arith.addi %0, %arg1 : i32
    %c0_i32 = arith.constant 0 : i32
    %2 = arith.minsi %1, %c0_i32 : i32
    %c0_i32_0 = arith.constant 0 : i32
    %c0_i32_1 = arith.constant 0 : i32
    return %2, %c0_i32_0 : i32, i32
  }
  func.func @transform_2(%arg0: i32, %arg1: i32) -> (i32, i32, i32) {
    %c0_i32 = arith.constant 0 : i32
    %c0_i32_0 = arith.constant 0 : i32
    %c0_i32_1 = arith.constant 0 : i32
    return %arg0, %c0_i32, %c0_i32_0 : i32, i32, i32
  }
}

</mosaic_0001>

<bundles_post_ra>
// kernel: tpu_custom_call.1
= control target key start
LH: loop header
LB: loop body
LE: loop exit
PB: predicated region body
PF: predicated region fallthrough
CT: control target
= control target key end

     0   :  { %7 = vsyncpa [#allocation3], 0  ;;  %s993_s0 = inlined_call_operand.hbm [shape: f32[16,128], index: 0, kind: input, shape index: {}]   ;;  %s994_s1 = inlined_call_operand.hbm [shape: f32[16,128], index: 1, kind: input, shape index: {}]   ;;  %s995_s2 = inlined_call_operand.hbm [shape: f32[2,8,128], index: 2, kind: output, shape index: {}]  }
   0x1   :  { %9 = vsyncpa [#allocation3 + $0x1], 0 }
   0x2   :  { %10 = vsyncpa [#allocation6], 0 }
   0x3   :  { %12 = vsyncpa [#allocation6 + $0x1], 0 }
   0x4   :  { %13 = vsyncpa [#allocation4], 0 }
   0x5   :  { %15 = vsyncpa [#allocation4 + $0x1], 0  ;;  %s790_s9 = smov 0   ;;  %s792_s10 = smov 0  }
   0x6   :  { %s794_s11 = smov 0   ;;  %s796_s12 = smov 0  }
   0x7   :  { %s798_s13 = smov 0   ;;  %s800_s14 = smov 0  }
   0x8   :  { %s802_s15 = smov 0   ;;  %s804_s16 = smov 0  }
   0x9 LB: > { %s473_s17 = sadd.s32 4294967295, %s767_s16   ;;  %s474_s18 = sadd.s32 4294967294, %s767_s16   ;;  %s767_s16 = sphi %s804_s16, %s21_s16   ;;  %s763_s15 = sphi %s802_s15, %s1014_s15   ;;  %s759_s14 = sphi %s800_s14, %s1013_s14   ;;  %s755_s13 = sphi %s798_s13, %s983_s13   ;;  %s751_s12 = sphi %s796_s12, %s1012_s12   ;;  %s747_s11 = sphi %s794_s11, %s1011_s11   ;;  %s743_s10 = sphi %s792_s10, %s1010_s10   ;;  %s739_s9 = sphi %s790_s9, %s1009_s9  }
   0xa   : > { %s33_s19 = sadd.s32 1, %s763_s15  ;;  %p736_p1 = scmp.ne.s32.totalorder %s755_s13, 0 }
   0xb   : > { %p35_p0 = scmp.ge.s32.totalorder %s33_s19, 2  ;;  %p54_p2 = scmp.eq.s32.totalorder %s767_s16, 0 }
   0xc   : > { %p59_p3 = scmp.ne.s32.totalorder %s755_s13, %s751_s12  ;;  %p60_p5 = scmp.eq.s32.totalorder %s473_s17, 0 }
   0xd   : > { %s1016_s19 = smov (%p35_p0, %s33_s19), 0  ;;  %p836_p4 = por %p736_p1, %p54_p2 }
   0xe   : > { %p840_p6 = por %p60_p5, %p59_p3  ;;  %s101_s22 = ssub.s32 %s763_s15, %s1016_s19 }
   0xf   : > { %p102_p7 = scmp.eq.s32.totalorder %s101_s22, 0  ;;  %s104_s23 = sadd.s32 1, %s747_s11 }
  0x10   : > { %s999_s21 = scalar_select %p840_p6, 1, 0 }
  0x11   : > { %s848_s24 = scalar_select %p102_p7, %s747_s11, %s104_s23  }
  0x12   : > { %p114_p8 = scmp.ne.s32.totalorder %s747_s11, %s743_s10  ;;  %p115_p9 = scmp.eq.s32.totalorder %s473_s17, 1 }
  0x13   : > { %p120_p10 = scmp.ne.s32.totalorder %s743_s10, %s739_s9  ;;  %p121_p11 = scmp.eq.s32.totalorder %s474_s18, 1 }
  0x14   : > { %p854_p12 = por %p115_p9, %p114_p8  ;;  %p513_p1 = scmp.lt.s32.totalorder %s767_s16, 2 }
  0x15   : > { %p859_p0 = por %p121_p11, %p120_p10  ;;  %s769_s27 = smov [#allocation2]  }
  0x16   : > { %s1000_s25 = scalar_select %p854_p12, 1, 0 }
  0x17   : > { %s1001_s26 = scalar_select %p859_p0, 1, 0 }
  0x18   : > { %s155_s28 = sshll.u32 %s769_s27, 4  ;;  %p866_p2 = pnand %p513_p1, %p836_p4  ;;  %s156_s28 = int_to_ptr.vmem [resolvable:$true] %s155_s28 }
  0x19   : > { %s606_s4 = scalar_lea.hbm %s993_s0, 256 }
  0x1a   : > { %p607_p3 = scmp.ne.s32.totalorder %s993_s0, %s606_s4  ;;  %p608_p5 = pneg %p866_p2 }
  0x1b   : > { %p613_p8 = scmp.lt.s32.totalorder %s606_s4, %s606_s4 }
  0x1c   : > { %p609_p7 = pnand %p608_p5, %p607_p3 }
  0x1e   : > { %p610_p4 = pneg %p609_p7 }
  0x20   : > { %p615_p9 = pnand %p613_p8, %p610_p4 }
  0x22   : > { %618 = shalt.err (!%p615_p9)
}
  0x23   : > { %s619_s7 = scalar_lea.vmem %s156_s28, 256  ;;  %s626_s8 = scalar_lea.vmem %s156_s28, 512 }
  0x24   : > { %p620_p10 = scmp.ne.s32.totalorder %s156_s28, %s619_s7  ;;  %p627_p13 = scmp.lt.s32.totalorder %s156_s28, %s156_s28 }
  0x25   : > { %p628_p0 = scmp.lt.s32.totalorder %s626_s8, %s619_s7 }
  0x26   : > { %p622_p11 = pnand %p620_p10, %p608_p5 }
  0x27   : > { %p629_p12 = por %p628_p0, %p627_p13 }
  0x28   : > { %p623_p1 = pneg %p622_p11 }
  0x2a   : > { %p630_p6 = pnand %p629_p12, %p623_p1 }
  0x2c   : > { %633 = shalt.err (!%p630_p6)
}
  0x2d   : > { %s770_s12 = smov 128   ;;  %s771_s17 = smov 8  }
  0x2e   : > { %505 = dma.hbm_to_vmem [thread:$0]  (!%p866_p2), %s993_s0, 256, %s156_s28, [#allocation3], %s770_s12, %s770_s12, %s771_s17  }
  0x2f   : > { %p483_p3 = scmp.ge.s32.totalorder %s767_s16, 1  ;;  %p187_p7 = scmp.lt.s32.totalorder %s767_s16, 3 }
  0x30   : > { %s772_s23 = smov [#allocation5]   ;;  %s634_s4 = scalar_lea.hbm %s994_s1, 256 }
  0x31   : > { %p891_p4 = pnand %p483_p3, %p187_p7  ;;  %s179_s27 = sshll.u32 %s772_s23, 4  ;;  %s180_s27 = int_to_ptr.vmem [resolvable:$true] %s179_s27 }
  0x32   : > { %p635_p6 = scmp.ne.s32.totalorder %s994_s1, %s634_s4  ;;  %p641_p0 = scmp.lt.s32.totalorder %s634_s4, %s634_s4 }
  0x33   : > { %s1003_s22 = scalar_select %p891_p4, 1, 0 }
  0x34   : > { %p637_p12 = pnand %p635_p6, %p608_p5 }
  0x36   : > { %p638_p13 = pneg %p637_p12 }
  0x38   : > { %p643_p8 = pnand %p641_p0, %p638_p13 }
  0x3a   : > { %646 = shalt.err (!%p643_p8)
}
  0x3b   : > { %s647_s28 = scalar_lea.vmem %s180_s27, 256  ;;  %s654_s7 = scalar_lea.vmem %s180_s27, 512 }
  0x3c   : > { %p648_p9 = scmp.ne.s32.totalorder %s180_s27, %s647_s28  ;;  %p655_p1 = scmp.lt.s32.totalorder %s180_s27, %s180_s27 }
  0x3d   : > { %p656_p3 = scmp.lt.s32.totalorder %s654_s7, %s647_s28 }
  0x3e   : > { %p650_p10 = pnand %p648_p9, %p608_p5 }
  0x3f   : > { %p657_p7 = por %p656_p3, %p655_p1 }
  0x40   : > { %p651_p11 = pneg %p650_p10 }
  0x42   : > { %p658_p4 = pnand %p657_p7, %p651_p11 }
  0x44   : > { %661 = shalt.err (!%p658_p4)
}
  0x45   : > { %508 = dma.hbm_to_vmem [thread:$0]  (!%p866_p2), %s994_s1, 256, %s180_s27, [#allocation6], %s770_s12, %s770_s12, %s771_s17  }
  0x46   : > { %p1004_p6 = scmp.ne.s32.totalorder %s1003_s22, 0 }
  0x47   : > { %s193_s20 = sand.u32 (!%p1004_p6), 1, %s755_s13   ;;  %p1005_p5 = scmp.ne.s32.totalorder (!%p1004_p6), %s999_s21, 0 }
  0x48   : > { %191 = sbr.rel (%p1004_p6) target bundleno = 204 (0xcc), region = 28  ;;  %s484_s23 = sshll.u32 (!%p1004_p6), %s193_s20, 4 }
  0x49   : > { %s194_s30 = scalar_lea.sflag (!%p1004_p6), [#allocation3], %s193_s20  ;;  %s197_s3 = scalar_lea.vmem (!%p1004_p6), [#allocation2], %s484_s23 }
  0x4d   : > { %725 = dma.done.wait (%p1005_p5), %s194_s30, 256  }
  0x4e   : > { %727 = vsyncadd (%p1005_p5), %s194_s30, 4294967040  ;;  %s203_s29 = scalar_lea.sflag [#allocation6], %s193_s20  ;;  %s919_s4 = scalar_lea.vmem [#allocation5], %s484_s23 }
  0x4f   : > { %729 = dma.done.wait (%p1005_p5), %s203_s29, 256  }
  0x50   : > { %731 = vsyncadd (%p1005_p5), %s203_s29, 4294967040  ;;  %s229_s12 = sand.u32 1, %s743_s10   ;;  %s487_s17 = sshll.u32 %s759_s14, 4  ;;  %v773_v0 = vmov 0.0   ;;  %v245_v1 = vld [vmem:[%s197_s3] sm:$0xff]  ;;  %v246_v2 = vld [vmem:[%s197_s3 + $0x8] sm:$0xff] }
  0x51   : > { %s486_s22 = sshll.u32 %s229_s12, 3  ;;  %s931_s27 = sadd.s32 16, %s487_s17  ;;  %v249_v3 = vand.u32 2147483647, %v245_v1  ;;  %v250_v4 = vand.u32 2147483647, %v246_v2 }
  0x52   : > { %s933_s5 = scalar_lea.vmem [#allocation7], %s486_s22  ;;  %vm289_vm0 = vcmp.ge.f32.partialorder %v245_v1, 0.0  ;;  %vm290_vm1 = vcmp.ge.f32.partialorder %v246_v2, 0.0  ;;  %v247_v20 = vld [vmem:[%s919_s4] sm:$0xff]  ;;  %v248_v22 = vld [vmem:[%s919_s4 + $0x8] sm:$0xff]  ;;  %v257_v39 = vmax.f32 %v245_v1, 0.0 }
  0x53   : > { %244 = vst [vmem:[%s933_s5] sm:$0xff] %v773_v0  ;;  %v251_v5 = vsub.f32 0.0, %v249_v3  ;;  %v252_v6 = vsub.f32 0.0, %v250_v4  ;;  %v259_v40 = vmul.f32 %v247_v20, %v245_v1  ;;  %v258_v41 = vmax.f32 %v246_v2, 0.0  ;;  %p488_p2 = scmp.gt.s32.totalorder %s931_s27, 16 }
  0x54   : > { %v260_v42 = vmul.f32 %v248_v22, %v246_v2  ;;  %v305_v48 = vmul.f32 -0.5, %v247_v20  ;;  %v306_v51 = vmul.f32 -0.5, %v248_v22 }
  0x55   : > { %v253_v7 = vmul.f32 1.442695, %v251_v5  ;;  %v255_v8 = vmul.f32 1.442695, %v252_v6  ;;  %v261_v47 = vsub.f32 %v257_v39, %v259_v40 }
  0x56   : > { %v262_v49 = vsub.f32 %v258_v41, %v260_v42  ;;  %v307_v54 = vadd.f32 0.75, %v305_v48  ;;  %v308_v57 = vadd.f32 0.75, %v306_v51 }
  0x57   : > { %590 = vpow2.f32 %v253_v7 }
  0x58   : > { %592 = vpow2.f32 %v255_v8 }
  0x64   : > { %v591_v9 = vpop.eup %590 }
  0x65   : > { %v593_v10 = vpop.eup %592  ;;  %v263_v11 = vadd.f32 1.0, %v591_v9  ;;  %v266_v28 = vmul.f32 -0.5, %v591_v9  ;;  %v269_v35 = vand.u32 2147483647, %v591_v9 }
  0x66   : > { %v272_v12 = vadd.f32 1.0, %v593_v10  ;;  %v275_v30 = vmul.f32 -0.5, %v593_v10  ;;  %v278_v38 = vand.u32 2147483647, %v593_v10 }
  0x67   : > { %594 = vrcp.f32 %v263_v11  ;;  %v267_v33 = vadd.f32 1.0, %v266_v28  ;;  %vm270_vm2 = vcmp.lt.f32.partialorder %v269_v35, 0.0004427343 }
  0x68   : > { %596 = vrcp.f32 %v272_v12  ;;  %v276_v36 = vadd.f32 1.0, %v275_v30  ;;  %vm279_vm3 = vcmp.lt.f32.partialorder %v278_v38, 0.0004427343 }
  0x69   : > { %598 = vlog2.f32 %v263_v11  ;;  %v268_v44 = vmul.f32 %v591_v9, %v267_v33 }
  0x6a   : > { %600 = vlog2.f32 %v272_v12  ;;  %v277_v46 = vmul.f32 %v593_v10, %v276_v36 }
  0x74   : > { %v595_v13 = vpop.eup %594 }
  0x75   : > { %v597_v14 = vpop.eup %596  ;;  %v291_v15 = vmul.f32 %v595_v13, %v591_v9 }
  0x76   : > { %v292_v16 = vmul.f32 %v597_v14, %v593_v10  ;;  %v599_v34 = vpop.eup %598 }
  0x77   : > { %v293_v17 = vsel %vm289_vm0, %v595_v13, %v291_v15  ;;  %v601_v37 = vpop.eup %600  ;;  %v265_v43 = vmul.f32 0.6931472, %v599_v34 }
  0x78   : > { %v294_v18 = vsel %vm290_vm1, %v597_v14, %v292_v16  ;;  %v295_v19 = vmul.f32 2.0, %v293_v17  ;;  %v274_v45 = vmul.f32 0.6931472, %v601_v37 }
  0x79   : > { %v296_v21 = vmul.f32 2.0, %v294_v18  ;;  %v271_v50 = vsel %vm270_vm2, %v268_v44, %v265_v43 }
  0x7a   : > { %v297_v23 = vsub.f32 1.0, %v295_v19  ;;  %v280_v52 = vsel %vm279_vm3, %v277_v46, %v274_v45  ;;  %v281_v53 = vadd.f32 %v271_v50, %v261_v47 }
  0x7b   : > { %v298_v24 = vsub.f32 1.0, %v296_v21  ;;  %v282_v56 = vadd.f32 %v280_v52, %v262_v49 }
  0x7c   : > { %v299_v25 = vmul.f32 %v297_v23, %v247_v20  ;;  %v325_v0 = vmul.f32 %v307_v54, %v281_v53 }
  0x7d   : > { %v300_v26 = vmul.f32 %v298_v24, %v248_v22  ;;  %v326_v3 = vmul.f32 %v308_v57, %v282_v56 }
  0x7e   : > { %v301_v27 = vadd.f32 %v299_v25, %v293_v17 }
  0x7f   : > { %v302_v29 = vadd.f32 %v300_v26, %v294_v18 }
  0x80   : > { %v303_v31 = vmax.f32 %v301_v27, 0.0 }
  0x81   : > { %v304_v32 = vmax.f32 %v302_v29, 0.0 }
  0x82   : > { %602 = vrsqrt.f32 %v303_v31  ;;  %vm311_vm4 = vcmp.eq.f32.partialorder %v303_v31, inf  ;;  %v314_v58 = vand.u32 2147483648, %v303_v31  ;;  %vm313_vm5 = vcmp.eq.f32.partialorder %v303_v31, 0.0 }
  0x83   : > { %604 = vrsqrt.f32 %v304_v32  ;;  %vm318_vm6 = vcmp.eq.f32.partialorder %v304_v32, inf  ;;  %v321_v61 = vand.u32 2147483648, %v304_v32  ;;  %vm320_vm7 = vcmp.eq.f32.partialorder %v304_v32, 0.0 }
  0x8f   : > { %v603_v55 = vpop.eup %602 }
  0x90   : > { %v605_v59 = vpop.eup %604  ;;  %v310_v60 = vmul.f32 %v603_v55, %v303_v31 }
  0x91   : > { %v317_v62 = vmul.f32 %v605_v59, %v304_v32 }
  0x92   : > { %v312_v63 = vsel %vm311_vm4, %v303_v31, %v310_v60 }
  0x93   : > { %v315_v1 = vsel %vm313_vm5, %v314_v58, %v312_v63  ;;  %v319_v2 = vsel %vm318_vm6, %v304_v32, %v317_v62  ;;  %335 = sbr.rel (%p488_p2) target bundleno = 158 (0x9e), region = 44 }
  0x94   : > { %v322_v4 = vsel %vm320_vm7, %v321_v61, %v319_v2  ;;  %v323_v5 = vmul.f32 %v315_v1, %v303_v31 }
  0x95   : > { %v324_v6 = vmul.f32 %v322_v4, %v304_v32 }
  0x96   : > { %v327_v7 = vmul.f32 %v325_v0, %v323_v5 }
  0x97   : > { %v328_v8 = vmul.f32 %v326_v3, %v324_v6 }
  0x98   : > { %v336_v9 = vld [vmem:[%s933_s5] sm:$0xff] }
  0x99   : > { %v337_v10 = vadd.f32 %v328_v8, %v327_v7 }
  0x9b   : > { %v338_v11 = vadd.f32 %v337_v10, %v336_v9 }
  0x9d   : > { %339 = vst [vmem:[%s933_s5] sm:$0xff] %v338_v11 }
  0x9e PF: > { %p489_p4 = scmp.le.s32.totalorder %s931_s27, 16 }
  0xa0   : > { %343 = sbr.rel (%p489_p4) target bundleno = 180 (0xb4), region = 48 }
  0xa5   : > { %v344_v12 = vlaneseq  ;;  %v348_v13 = vstv %s487_s17  ;;  %v347_v19 = vld [vmem:[%s933_s5] sm:$0xff] }
  0xa7   : > { %v345_v14 = vshrl.u32 %v344_v12, 7 }
  0xa9   : > { %v346_v15 = vadd.s32 8, %v345_v14  ;;  %v349_v16 = vadd.s32 %v348_v13, %v345_v14 }
  0xab   : > { %v350_v17 = vadd.s32 %v348_v13, %v346_v15  ;;  %vm351_vm8 = vcmp.lt.s32.totalorder %v349_v16, 16 }
  0xac   : > { %v353_v18 = vsel %vm351_vm8, %v327_v7, 0.0 }
  0xad   : > { %vm352_vm9 = vcmp.lt.s32.totalorder %v350_v17, 16 }
  0xae   : > { %v354_v20 = vsel %vm352_vm9, %v328_v8, 0.0 }
  0xaf   : > { %v355_v21 = vadd.f32 %v354_v20, %v353_v18 }
  0xb1   : > { %v356_v22 = vadd.f32 %v355_v21, %v347_v19 }
  0xb3   : > { %357 = vst [vmem:[%s933_s5] sm:$0xff] %v356_v22 }
  0xb4 PF: > { %s491_s21 = sshll.u32 %s759_s14, 7  ;;  %s372_s8 = sshll.u32 %s933_s5, 4  ;;  %s373_s8 = int_to_ptr.vmem [resolvable:$true] %s372_s8 }
  0xb5   : > { %s370_s7 = scalar_lea.hbm %s995_s2, %s491_s21  ;;  %s359_s18 = scalar_lea.sflag [#allocation4], %s229_s12 }
  0xb6   : > { %s662_s20 = scalar_lea.vmem %s373_s8, 128  ;;  %p1006_p13 = scmp.ne.s32.totalorder %s1000_s25, 0 }
  0xb7   : > { %p663_p12 = scmp.ne.s32.totalorder %s373_s8, %s662_s20  ;;  %s774_s23 = smov [#allocation7]  }
  0xb8   : > { %s666_s30 = sshll.u32 %s774_s23, 4  ;;  %s667_s30 = int_to_ptr.vmem [resolvable:$false] %s666_s30 }
  0xb9   : > { %p664_p0 = pnand %p663_p12, %p1006_p13  ;;  %s668_s3 = scalar_lea.vmem %s667_s30, 256 }
  0xba   : > { %p669_p9 = scmp.lt.s32.totalorder %s373_s8, %s667_s30  ;;  %p670_p10 = scmp.lt.s32.totalorder %s668_s3, %s662_s20 }
  0xbb   : > { %p665_p8 = pneg %p664_p0 }
  0xbc   : > { %p671_p11 = por %p670_p10, %p669_p9 }
  0xbe   : > { %p672_p1 = pnand %p671_p11, %p665_p8 }
  0xc0   : > { %675 = shalt.err (!%p672_p1)
}
  0xc1   : > { %s676_s14 = scalar_lea.hbm %s370_s7, 128  ;;  %s680_s12 = scalar_lea.hbm %s995_s2, 256 }
  0xc2   : > { %p677_p3 = scmp.ne.s32.totalorder %s370_s7, %s676_s14  ;;  %p681_p5 = scmp.lt.s32.totalorder %s370_s7, %s995_s2 }
  0xc3   : > { %p682_p2 = scmp.lt.s32.totalorder %s680_s12, %s676_s14 }
  0xc4   : > { %p678_p7 = pnand %p677_p3, %p1006_p13 }
  0xc5   : > { %p683_p4 = por %p682_p2, %p681_p5 }
  0xc6   : > { %p679_p6 = pneg %p678_p7 }
  0xc8   : > { %p684_p12 = pnand %p683_p4, %p679_p6 }
  0xca   : > { %687 = shalt.err (!%p684_p12)
}
  0xcb   : > { %500 = dma.vmem_to_hbm [thread:$0]  (%p1006_p13), %s373_s8, 128, %s370_s7, %s359_s18  }
  0xcc PF: > { %s384_s27 = sand.u32 1, %s739_s9   ;;  %p1007_p0 = scmp.ne.s32.totalorder %s1001_s26, 0 }
  0xcd   : > { %p1008_p8 = scmp.ge.s32.totalorder %s767_s16, 2  ;;  %s385_s5 = scalar_lea.sflag [#allocation4], %s384_s27 }
  0xcf   : > { %p510_p9 = pnand %p1008_p8, %p1007_p0 }
  0xd1   : > { %p511_p10 = pneg %p510_p9 }
  0xd3   : > { %733 = dma.done.wait (%p511_p10), %s385_s5, 128  }
  0xd4   : > { %735 = vsyncadd (%p511_p10), %s385_s5, 4294967168  ;;  %s21_s16 = sadd.s32 1, %s767_s16   ;;  %s1009_s9 = smov %s743_s10 }
  0xd5   : > { %p18_p11 = scmp.ge.s32.totalorder %s21_s16, 4   ;;  %s1010_s10 = smov %s747_s11 }
  0xd6   : > { %s1011_s11 = smov %s848_s24  ;;  %s1012_s12 = smov %s755_s13 }
  0xd7   : > { %s983_s13 = smov 0   ;;  %s1013_s14 = smov %s763_s15 }
  0xd8   : > { %s1014_s15 = smov %s1016_s19  ;;  %20 = sbr.rel (!%p18_p11) target bundleno = 9 (0x9), region = 98 }
  0xdd   :  { %390 = vsyncpa [#allocation3], 1 }
  0xde   :  { %392 = vsyncpa [#allocation3 + $0x1], 1 }
  0xdf   :  { %393 = vsyncpa [#allocation6], 1 }
  0xe0   :  { %395 = vsyncpa [#allocation6 + $0x1], 1 }
  0xe1   :  { %396 = vsyncpa [#allocation4], 1 }
  0xe2   :  { %398 = vsyncpa [#allocation4 + $0x1], 1 }

</bundles_post_ra>
